<compile_context>
chip_gen: v7x
topology: tpu7x:2x2x1
jax: 0.10.0
libtpu: 0.0.40
codegen_flags: <defaults>
</compile_context>

<pallas_src>
import functools

import jax
import jax.numpy as jnp
from jax.experimental import pallas as pl
from jax.experimental.pallas import tpu as pltpu

LANE = 128          # TPU lane width; batch is laid out (rows, LANE).
BLOCK_ROWS = 512    # rows per grid step for large batches (256 KiB f32 block).


def _mlp_kernel(n_ref, p_ref, x_ref, o_ref, *, hdim, block_rows):
    # n_ref: SMEM (1,)    int32 -- number of valid batch elements (for masking)
    # p_ref: SMEM (3H+1,) f32   -- [w1(0:H) | b1(H:2H) | w2(2H:3H) | b2]
    # x_ref: VMEM (block_rows, LANE) f32 -- batch, sublane x lane dense
    # o_ref: VMEM (block_rows, LANE) f32
    x = x_ref[...]

    # fc2 bias as the accumulator seed; fc1/fc2 unrolled over H as scalar-splat
    # FMAs (pure VPU: 4 VALU slots; no XLU reduce, no MXU).
    acc = jnp.full_like(x, p_ref[3 * hdim])
    for j in range(hdim):
        h_j = jnp.maximum(p_ref[j] * x + p_ref[hdim + j], 0.0)   # fc1 + ReLU
        acc = acc + p_ref[2 * hdim + j] * h_j                     # fc2 accumulate
    out = jnp.maximum(acc, 0.0)                                   # fc2 ReLU

    # Zero the padded tail so the padded (rows, LANE) output is safe to use.
    base = pl.program_id(0) * (block_rows * LANE)
    row = jax.lax.broadcasted_iota(jnp.int32, x.shape, 0)
    lane = jax.lax.broadcasted_iota(jnp.int32, x.shape, 1)
    flat_idx = base + row * LANE + lane
    o_ref[...] = jnp.where(flat_idx < n_ref[0], out, 0.0)


def pack_params(w1, b1, w2, b2):
    """Fuse the four tiny parameter tensors into one SMEM-friendly 1-D slab.

    PyTorch layout: w1 (H,1), b1 (H,), w2 (1,H), b2 (1,)  (weight = (out,in)).
    Done ONCE at init -- not part of the per-forward path.
    """
    return jnp.concatenate([w1[:, 0], b1, w2[0, :], b2]).astype(jnp.float32)


@jax.jit
def net_forward(x, params):
    """relu(fc2(relu(fc1(x)))) for x of shape (N, 1); returns (N, 1)."""
    n = x.shape[0]
    hdim = (params.shape[0] - 1) // 3

    rows = pl.cdiv(n, LANE)
    if rows <= BLOCK_ROWS:
        block_rows = rows                   # single block == full array dims
        grid_rows = rows
    else:
        block_rows = BLOCK_ROWS             # multiple of 8 -> clean (8,128) tiling
        grid_rows = pl.cdiv(rows, BLOCK_ROWS) * BLOCK_ROWS
    n_pad = grid_rows * LANE

    # Lane/sublane-dense batch layout; jnp.pad fuses under jit (no scatter).
    x_lanes = jnp.pad(x[:, 0], (0, n_pad - n)).reshape(grid_rows, LANE)
    n_valid = jnp.full((1,), n, dtype=jnp.int32)

    kernel = functools.partial(_mlp_kernel, hdim=hdim, block_rows=block_rows)
    out = pl.pallas_call(
        kernel,
        out_shape=jax.ShapeDtypeStruct((grid_rows, LANE), jnp.float32),
        grid=(grid_rows // block_rows,),
        in_specs=[
            pl.BlockSpec(memory_space=pltpu.MemorySpace.SMEM),   # n_valid
            pl.BlockSpec(memory_space=pltpu.MemorySpace.SMEM),   # fused params
            pl.BlockSpec((block_rows, LANE), lambda i: (i, 0)),  # x row tiles
        ],
        out_specs=pl.BlockSpec((block_rows, LANE), lambda i: (i, 0)),
        compiler_params=pltpu.CompilerParams(
            dimension_semantics=("parallel",)),   # batch tiles -> both v7x TCs
    )(n_valid, params, x_lanes)

    return out.reshape(-1)[:n].reshape(n, 1)


def init_params(key, hdim=10):
    """nn.Linear-style U(-1/sqrt(fan_in), 1/sqrt(fan_in)) init."""
    k1, k2, k3, k4 = jax.random.split(key, 4)
    b1_bound = 1.0                              # fan_in = 1
    b2_bound = 1.0 / jnp.sqrt(float(hdim))      # fan_in = hdim
    w1 = jax.random.uniform(k1, (hdim, 1), jnp.float32, -b1_bound, b1_bound)
    b1 = jax.random.uniform(k2, (hdim,), jnp.float32, -b1_bound, b1_bound)
    w2 = jax.random.uniform(k3, (1, hdim), jnp.float32, -b2_bound, b2_bound)
    b2 = jax.random.uniform(k4, (1,), jnp.float32, -b2_bound, b2_bound)
    return w1, b1, w2, b2


if __name__ == "__main__":
    key = jax.random.PRNGKey(0)

    # Input matching the original script: x = unsqueeze(linspace(-1, 1, 100), 1)
    x = jnp.linspace(-1.0, 1.0, 100, dtype=jnp.float32).reshape(100, 1)

    w1, b1, w2, b2 = init_params(key)
    params = pack_params(w1, b1, w2, b2)   # hoisted: packed once at init

    out = jax.block_until_ready(net_forward(x, params))

    # Pure-JAX reference: relu(relu(x @ W1.T + b1) @ W2.T + b2)
    hidden = jnp.maximum(x @ w1.T + b1, 0.0)
    ref = jnp.maximum(hidden @ w2.T + b2, 0.0)
    assert out.shape == (100, 1)
    assert jnp.allclose(out, ref, atol=1e-5), "mismatch vs reference"

    print("KERNEL_OK")
</pallas_src>

<mosaic_0001>
module attributes {stable_mosaic.version = 11 : i64} {
  func.func @_mlp_kernel(%arg0: i32, %arg1: memref<1xi32, #tpu.memory_space<smem>>, %arg2: memref<31xf32, #tpu.memory_space<smem>>, %arg3: memref<1x128xf32, #tpu.memory_space<vmem>>, %arg4: memref<1x128xf32, #tpu.memory_space<vmem>>) attributes {dimension_semantics = [#tpu.dimension_semantics<parallel>], iteration_bounds = array<i64: 1>, scalar_prefetch = 0 : i64, scratch_operands = 0 : i64, tpu.core_type = #tpu.core_type<tc>, window_params = [{transform_indices = @transform_0, window_bounds = array<i64: 1>}, {transform_indices = @transform_1, window_bounds = array<i64: 31>}, {transform_indices = @transform_2, window_bounds = array<i64: 1, 128>}, {transform_indices = @transform_3, window_bounds = array<i64: 1, 128>}]} {
    %c0 = arith.constant 0 : index
    %c0_0 = arith.constant 0 : index
    %0 = vector.load %arg3[%c0, %c0_0] : memref<1x128xf32, #tpu.memory_space<vmem>>, vector<1x128xf32>
    %c30 = arith.constant 30 : index
    %1 = memref.load %arg2[%c30] : memref<31xf32, #tpu.memory_space<smem>>
    %2 = vector.broadcast %1 : f32 to vector<1x128xf32>
    %c0_1 = arith.constant 0 : index
    %3 = memref.load %arg2[%c0_1] : memref<31xf32, #tpu.memory_space<smem>>
    %4 = vector.broadcast %3 : f32 to vector<1x128xf32>
    %5 = arith.mulf %4, %0 : vector<1x128xf32>
    %c10 = arith.constant 10 : index
    %6 = memref.load %arg2[%c10] : memref<31xf32, #tpu.memory_space<smem>>
    %7 = vector.broadcast %6 : f32 to vector<1x128xf32>
    %8 = arith.addf %5, %7 : vector<1x128xf32>
    %cst = arith.constant 0.000000e+00 : f32
    %9 = vector.broadcast %cst : f32 to vector<1x128xf32>
    %10 = arith.maximumf %8, %9 : vector<1x128xf32>
    %c20 = arith.constant 20 : index
    %11 = memref.load %arg2[%c20] : memref<31xf32, #tpu.memory_space<smem>>
    %12 = vector.broadcast %11 : f32 to vector<1x128xf32>
    %13 = arith.mulf %12, %10 : vector<1x128xf32>
    %14 = arith.addf %2, %13 : vector<1x128xf32>
    %c1 = arith.constant 1 : index
    %15 = memref.load %arg2[%c1] : memref<31xf32, #tpu.memory_space<smem>>
    %16 = vector.broadcast %15 : f32 to vector<1x128xf32>
    %17 = arith.mulf %16, %0 : vector<1x128xf32>
    %c11 = arith.constant 11 : index
    %18 = memref.load %arg2[%c11] : memref<31xf32, #tpu.memory_space<smem>>
    %19 = vector.broadcast %18 : f32 to vector<1x128xf32>
    %20 = arith.addf %17, %19 : vector<1x128xf32>
    %cst_2 = arith.constant 0.000000e+00 : f32
    %21 = vector.broadcast %cst_2 : f32 to vector<1x128xf32>
    %22 = arith.maximumf %20, %21 : vector<1x128xf32>
    %c21 = arith.constant 21 : index
    %23 = memref.load %arg2[%c21] : memref<31xf32, #tpu.memory_space<smem>>
    %24 = vector.broadcast %23 : f32 to vector<1x128xf32>
    %25 = arith.mulf %24, %22 : vector<1x128xf32>
    %26 = arith.addf %14, %25 : vector<1x128xf32>
    %c2 = arith.constant 2 : index
    %27 = memref.load %arg2[%c2] : memref<31xf32, #tpu.memory_space<smem>>
    %28 = vector.broadcast %27 : f32 to vector<1x128xf32>
    %29 = arith.mulf %28, %0 : vector<1x128xf32>
    %c12 = arith.constant 12 : index
    %30 = memref.load %arg2[%c12] : memref<31xf32, #tpu.memory_space<smem>>
    %31 = vector.broadcast %30 : f32 to vector<1x128xf32>
    %32 = arith.addf %29, %31 : vector<1x128xf32>
    %cst_3 = arith.constant 0.000000e+00 : f32
    %33 = vector.broadcast %cst_3 : f32 to vector<1x128xf32>
    %34 = arith.maximumf %32, %33 : vector<1x128xf32>
    %c22 = arith.constant 22 : index
    %35 = memref.load %arg2[%c22] : memref<31xf32, #tpu.memory_space<smem>>
    %36 = vector.broadcast %35 : f32 to vector<1x128xf32>
    %37 = arith.mulf %36, %34 : vector<1x128xf32>
    %38 = arith.addf %26, %37 : vector<1x128xf32>
    %c3 = arith.constant 3 : index
    %39 = memref.load %arg2[%c3] : memref<31xf32, #tpu.memory_space<smem>>
    %40 = vector.broadcast %39 : f32 to vector<1x128xf32>
    %41 = arith.mulf %40, %0 : vector<1x128xf32>
    %c13 = arith.constant 13 : index
    %42 = memref.load %arg2[%c13] : memref<31xf32, #tpu.memory_space<smem>>
    %43 = vector.broadcast %42 : f32 to vector<1x128xf32>
    %44 = arith.addf %41, %43 : vector<1x128xf32>
    %cst_4 = arith.constant 0.000000e+00 : f32
    %45 = vector.broadcast %cst_4 : f32 to vector<1x128xf32>
    %46 = arith.maximumf %44, %45 : vector<1x128xf32>
    %c23 = arith.constant 23 : index
    %47 = memref.load %arg2[%c23] : memref<31xf32, #tpu.memory_space<smem>>
    %48 = vector.broadcast %47 : f32 to vector<1x128xf32>
    %49 = arith.mulf %48, %46 : vector<1x128xf32>
    %50 = arith.addf %38, %49 : vector<1x128xf32>
    %c4 = arith.constant 4 : index
    %51 = memref.load %arg2[%c4] : memref<31xf32, #tpu.memory_space<smem>>
    %52 = vector.broadcast %51 : f32 to vector<1x128xf32>
    %53 = arith.mulf %52, %0 : vector<1x128xf32>
    %c14 = arith.constant 14 : index
    %54 = memref.load %arg2[%c14] : memref<31xf32, #tpu.memory_space<smem>>
    %55 = vector.broadcast %54 : f32 to vector<1x128xf32>
    %56 = arith.addf %53, %55 : vector<1x128xf32>
    %cst_5 = arith.constant 0.000000e+00 : f32
    %57 = vector.broadcast %cst_5 : f32 to vector<1x128xf32>
    %58 = arith.maximumf %56, %57 : vector<1x128xf32>
    %c24 = arith.constant 24 : index
    %59 = memref.load %arg2[%c24] : memref<31xf32, #tpu.memory_space<smem>>
    %60 = vector.broadcast %59 : f32 to vector<1x128xf32>
    %61 = arith.mulf %60, %58 : vector<1x128xf32>
    %62 = arith.addf %50, %61 : vector<1x128xf32>
    %c5 = arith.constant 5 : index
    %63 = memref.load %arg2[%c5] : memref<31xf32, #tpu.memory_space<smem>>
    %64 = vector.broadcast %63 : f32 to vector<1x128xf32>
    %65 = arith.mulf %64, %0 : vector<1x128xf32>
    %c15 = arith.constant 15 : index
    %66 = memref.load %arg2[%c15] : memref<31xf32, #tpu.memory_space<smem>>
    %67 = vector.broadcast %66 : f32 to vector<1x128xf32>
    %68 = arith.addf %65, %67 : vector<1x128xf32>
    %cst_6 = arith.constant 0.000000e+00 : f32
    %69 = vector.broadcast %cst_6 : f32 to vector<1x128xf32>
    %70 = arith.maximumf %68, %69 : vector<1x128xf32>
    %c25 = arith.constant 25 : index
    %71 = memref.load %arg2[%c25] : memref<31xf32, #tpu.memory_space<smem>>
    %72 = vector.broadcast %71 : f32 to vector<1x128xf32>
    %73 = arith.mulf %72, %70 : vector<1x128xf32>
    %74 = arith.addf %62, %73 : vector<1x128xf32>
    %c6 = arith.constant 6 : index
    %75 = memref.load %arg2[%c6] : memref<31xf32, #tpu.memory_space<smem>>
    %76 = vector.broadcast %75 : f32 to vector<1x128xf32>
    %77 = arith.mulf %76, %0 : vector<1x128xf32>
    %c16 = arith.constant 16 : index
    %78 = memref.load %arg2[%c16] : memref<31xf32, #tpu.memory_space<smem>>
    %79 = vector.broadcast %78 : f32 to vector<1x128xf32>
    %80 = arith.addf %77, %79 : vector<1x128xf32>
    %cst_7 = arith.constant 0.000000e+00 : f32
    %81 = vector.broadcast %cst_7 : f32 to vector<1x128xf32>
    %82 = arith.maximumf %80, %81 : vector<1x128xf32>
    %c26 = arith.constant 26 : index
    %83 = memref.load %arg2[%c26] : memref<31xf32, #tpu.memory_space<smem>>
    %84 = vector.broadcast %83 : f32 to vector<1x128xf32>
    %85 = arith.mulf %84, %82 : vector<1x128xf32>
    %86 = arith.addf %74, %85 : vector<1x128xf32>
    %c7 = arith.constant 7 : index
    %87 = memref.load %arg2[%c7] : memref<31xf32, #tpu.memory_space<smem>>
    %88 = vector.broadcast %87 : f32 to vector<1x128xf32>
    %89 = arith.mulf %88, %0 : vector<1x128xf32>
    %c17 = arith.constant 17 : index
    %90 = memref.load %arg2[%c17] : memref<31xf32, #tpu.memory_space<smem>>
    %91 = vector.broadcast %90 : f32 to vector<1x128xf32>
    %92 = arith.addf %89, %91 : vector<1x128xf32>
    %cst_8 = arith.constant 0.000000e+00 : f32
    %93 = vector.broadcast %cst_8 : f32 to vector<1x128xf32>
    %94 = arith.maximumf %92, %93 : vector<1x128xf32>
    %c27 = arith.constant 27 : index
    %95 = memref.load %arg2[%c27] : memref<31xf32, #tpu.memory_space<smem>>
    %96 = vector.broadcast %95 : f32 to vector<1x128xf32>
    %97 = arith.mulf %96, %94 : vector<1x128xf32>
    %98 = arith.addf %86, %97 : vector<1x128xf32>
    %c8 = arith.constant 8 : index
    %99 = memref.load %arg2[%c8] : memref<31xf32, #tpu.memory_space<smem>>
    %100 = vector.broadcast %99 : f32 to vector<1x128xf32>
    %101 = arith.mulf %100, %0 : vector<1x128xf32>
    %c18 = arith.constant 18 : index
    %102 = memref.load %arg2[%c18] : memref<31xf32, #tpu.memory_space<smem>>
    %103 = vector.broadcast %102 : f32 to vector<1x128xf32>
    %104 = arith.addf %101, %103 : vector<1x128xf32>
    %cst_9 = arith.constant 0.000000e+00 : f32
    %105 = vector.broadcast %cst_9 : f32 to vector<1x128xf32>
    %106 = arith.maximumf %104, %105 : vector<1x128xf32>
    %c28 = arith.constant 28 : index
    %107 = memref.load %arg2[%c28] : memref<31xf32, #tpu.memory_space<smem>>
    %108 = vector.broadcast %107 : f32 to vector<1x128xf32>
    %109 = arith.mulf %108, %106 : vector<1x128xf32>
    %110 = arith.addf %98, %109 : vector<1x128xf32>
    %c9 = arith.constant 9 : index
    %111 = memref.load %arg2[%c9] : memref<31xf32, #tpu.memory_space<smem>>
    %112 = vector.broadcast %111 : f32 to vector<1x128xf32>
    %113 = arith.mulf %112, %0 : vector<1x128xf32>
    %c19 = arith.constant 19 : index
    %114 = memref.load %arg2[%c19] : memref<31xf32, #tpu.memory_space<smem>>
    %115 = vector.broadcast %114 : f32 to vector<1x128xf32>
    %116 = arith.addf %113, %115 : vector<1x128xf32>
    %cst_10 = arith.constant 0.000000e+00 : f32
    %117 = vector.broadcast %cst_10 : f32 to vector<1x128xf32>
    %118 = arith.maximumf %116, %117 : vector<1x128xf32>
    %c29 = arith.constant 29 : index
    %119 = memref.load %arg2[%c29] : memref<31xf32, #tpu.memory_space<smem>>
    %120 = vector.broadcast %119 : f32 to vector<1x128xf32>
    %121 = arith.mulf %120, %118 : vector<1x128xf32>
    %122 = arith.addf %110, %121 : vector<1x128xf32>
    %cst_11 = arith.constant 0.000000e+00 : f32
    %123 = vector.broadcast %cst_11 : f32 to vector<1x128xf32>
    %124 = arith.maximumf %122, %123 : vector<1x128xf32>
    %c128_i32 = arith.constant 128 : i32
    %125 = arith.muli %arg0, %c128_i32 : i32
    %126 = tpu.iota {dimensions = array<i32: 0>} : vector<1x128xi32>
    %127 = tpu.iota {dimensions = array<i32: 1>} : vector<1x128xi32>
    %c128_i32_12 = arith.constant 128 : i32
    %128 = vector.broadcast %c128_i32_12 : i32 to vector<1x128xi32>
    %129 = arith.muli %126, %128 : vector<1x128xi32>
    %130 = vector.broadcast %125 : i32 to vector<1x128xi32>
    %131 = arith.addi %130, %129 : vector<1x128xi32>
    %132 = arith.addi %131, %127 : vector<1x128xi32>
    %c0_13 = arith.constant 0 : index
    %133 = memref.load %arg1[%c0_13] : memref<1xi32, #tpu.memory_space<smem>>
    %134 = vector.broadcast %133 : i32 to vector<1x128xi32>
    %135 = arith.cmpi slt, %132, %134 : vector<1x128xi32>
    %cst_14 = arith.constant 0.000000e+00 : f32
    %136 = vector.broadcast %cst_14 : f32 to vector<1x128xf32>
    %137 = arith.select %135, %124, %136 : vector<1x128xi1>, vector<1x128xf32>
    %c0_15 = arith.constant 0 : index
    %c0_16 = arith.constant 0 : index
    %138 = vector.load %arg4[%c0_15, %c0_16] : memref<1x128xf32, #tpu.memory_space<vmem>>, vector<1x128xf32>
    tpu.vector_store %arg4[%c0_15, %c0_16], %137 {strides = array<i32>} : memref<1x128xf32, #tpu.memory_space<vmem>>, vector<1x128xf32>,
    return
  }
  func.func @transform_0(%arg0: i32) -> i32 {
    %c0_i32 = arith.constant 0 : i32
    %c0_i32_0 = arith.constant 0 : i32
    return %c0_i32 : i32
  }
  func.func @transform_1(%arg0: i32) -> i32 {
    %c0_i32 = arith.constant 0 : i32
    %c0_i32_0 = arith.constant 0 : i32
    return %c0_i32 : i32
  }
  func.func @transform_2(%arg0: i32) -> (i32, i32) {
    %c0_i32 = arith.constant 0 : i32
    %c0_i32_0 = arith.constant 0 : i32
    return %arg0, %c0_i32 : i32, i32
  }
  func.func @transform_3(%arg0: i32) -> (i32, i32) {
    %c0_i32 = arith.constant 0 : i32
    %c0_i32_0 = arith.constant 0 : i32
    return %arg0, %c0_i32 : i32, i32
  }
}

</mosaic_0001>

<bundles_post_ra>
// kernel: net_forward.1
= control target key start
LH: loop header
LB: loop body
LE: loop exit
PB: predicated region body
PF: predicated region fallthrough
CT: control target
= control target key end

     0   :  { %9 = vsyncpa [#allocation4], 0  ;;  %s334_s0 = inlined_call_operand.<no memory space> [shape: s32[1], index: 0, kind: input, shape index: {}]   ;;  %s335_s1 = inlined_call_operand.vmem [shape: f32[31], index: 1, kind: input, shape index: {}]   ;;  %s336_s2 = inlined_call_operand.vmem [shape: f32[1,128], index: 2, kind: input, shape index: {}]   ;;  %s337_s3 = inlined_call_operand.vmem [shape: f32[1,128], index: 3, kind: output, shape index: {}]  }
   0x1   :  { %s18_s14 = sshll.u32 %s335_s1, 4  ;;  %s19_s14 = int_to_ptr.vmem [resolvable:$true] %s18_s14 }
   0x2   :  { %s192_s15 = scalar_lea.vmem %s19_s14, 16  ;;  %p197_p1 = scmp.lt.s32.totalorder %s19_s14, %s19_s14 }
   0x3   :  { %p193_p0 = scmp.ne.s32.totalorder %s19_s14, %s192_s15  ;;  %p198_p2 = scmp.lt.s32.totalorder %s192_s15, %s192_s15 }
   0x5   :  { %p199_p3 = por %p198_p2, %p197_p1 }
   0x7   :  { %p200_p4 = pnand %p199_p3, %p193_p0 }
   0x9   :  { %203 = shalt.err (!%p200_p4)
}
   0xa   :  { %s206_s16 = smov [#allocation3]  }
   0xb   :  { %21 = dma.vmem_to_smem %s19_s14, 16, %s206_s16, [#allocation4]  }
   0xc   :  { %204 = dma.done.wait [#allocation4], 16  }
   0xd   :  { %205 = vsyncadd [#allocation4], 4294967280 }
   0xe   :  { %27 = sfence }
   0xf   :  { %s230_s17 = sld [smem:[#allocation3 + $0x1e]]  ;;  %s31_s18 = sld [smem:[#allocation3]]  ;;  %v241_v0 = vld [vmem:[%s336_s2] sm:$0x1]  ;;  %v143_v6 = vlaneseq }
  0x10   :  { %s162_s19 = sld [smem:[#allocation3 + $0xa]]  ;;  %s232_s20 = sld [smem:[#allocation3 + $0x14]] }
  0x11   :  { %s164_s1 = sld [smem:[#allocation3 + $0x1]]  ;;  %s234_s21 = sld [smem:[#allocation3 + $0xb]]  ;;  %v144_v62 = vshrl.u32 %v143_v6, 7 }
  0x12   :  { %s236_s22 = sld [smem:[#allocation3 + $0x15]]  ;;  %s167_s23 = sld [smem:[#allocation3 + $0x2]] }
  0x13   :  { %s243_s26 = sld [smem:[#allocation3 + $0xc]]  ;;  %s245_s27 = sld [smem:[#allocation3 + $0x16]] }
  0x14   :  { %s247_s28 = sld [smem:[#allocation3 + $0x3]]  ;;  %s249_s29 = sld [smem:[#allocation3 + $0xd]] }
  0x15   :  { %v32_v1 = vstv %s31_s18  ;;  %s251_s30 = sld [smem:[#allocation3 + $0x17]]  ;;  %s253_s4 = sld [smem:[#allocation3 + $0x4]]  ;;  %v30_v7 = vstv %s230_s17 }
  0x16   :  { %v33_v2 = vmul.f32 %v32_v1, %v241_v0  ;;  %v35_v3 = vstv %s162_s19  ;;  %s256_s2 = sld [smem:[#allocation3 + $0xe]]  ;;  %s258_s5 = sld [smem:[#allocation3 + $0x18]]  ;;  %v39_v11 = vstv %s232_s20 }
  0x17   :  { %v43_v4 = vstv %s164_s1  ;;  %v46_v5 = vstv %s234_s21  ;;  %s261_s6 = sld [smem:[#allocation3 + $0x5]]  ;;  %s263_s7 = sld [smem:[#allocation3 + $0xf]] }
  0x18   :  { %v36_v8 = vadd.f32 %v35_v3, %v33_v2  ;;  %v44_v9 = vmul.f32 %v43_v4, %v241_v0  ;;  %v54_v10 = vstv %s167_s23  ;;  %s267_s8 = sld [smem:[#allocation3 + $0x6]]  ;;  %v50_v12 = vstv %s236_s22  ;;  %s273_s9 = sld [smem:[#allocation3 + $0x19]] }
  0x19   :  { %v55_v13 = vmul.f32 %v54_v10, %v241_v0  ;;  %v57_v14 = vstv %s243_s26  ;;  %s275_s10 = sld [smem:[#allocation3 + $0x10]]  ;;  %s279_s11 = sld [smem:[#allocation3 + $0x7]]  ;;  %v61_v20 = vstv %s245_s27 }
  0x1a   :  { %v37_v15 = vmax.f32 %v36_v8, 0.0  ;;  %v47_v16 = vadd.f32 %v46_v5, %v44_v9  ;;  %v65_v17 = vstv %s247_s28  ;;  %v68_v18 = vstv %s249_s29  ;;  %s284_s12 = sld [smem:[#allocation3 + $0x1a]]  ;;  %s286_s13 = sld [smem:[#allocation3 + $0x11]] }
  0x1b   :  { %v58_v19 = vadd.f32 %v57_v14, %v55_v13  ;;  %v66_v21 = vmul.f32 %v65_v17, %v241_v0  ;;  %v76_v22 = vstv %s253_s4  ;;  %s290_s14 = sld [smem:[#allocation3 + $0x8]]  ;;  %s292_s15 = sld [smem:[#allocation3 + $0x12]]  ;;  %v72_v29 = vstv %s251_s30 }
  0x1c   :  { %v40_v23 = vmul.f32 %v39_v11, %v37_v15  ;;  %v48_v24 = vmax.f32 %v47_v16, 0.0  ;;  %v77_v25 = vmul.f32 %v76_v22, %v241_v0  ;;  %v79_v26 = vstv %s256_s2  ;;  %s296_s16 = sld [smem:[#allocation3 + $0x1b]]  ;;  %s299_s17 = sld [smem:[#allocation3 + $0x9]] }
  0x1d   :  { %v59_v27 = vmax.f32 %v58_v19, 0.0  ;;  %v69_v28 = vadd.f32 %v68_v18, %v66_v21  ;;  %v87_v30 = vstv %s261_s6  ;;  %s301_s18 = sld [smem:[#allocation3 + $0x13]]  ;;  %v83_v37 = vstv %s258_s5  ;;  %s306_s19 = sld [smem:[#allocation3 + $0x1c]] }
  0x1e   :  { %v41_v31 = vadd.f32 %v40_v23, %v30_v7  ;;  %v51_v32 = vmul.f32 %v50_v12, %v48_v24  ;;  %v80_v33 = vadd.f32 %v79_v26, %v77_v25  ;;  %v88_v34 = vmul.f32 %v87_v30, %v241_v0  ;;  %s312_s20 = sld [smem:[#allocation3 + $0x1d]] }
  0x1f   :  { %v62_v35 = vmul.f32 %v61_v20, %v59_v27  ;;  %v70_v36 = vmax.f32 %v69_v28, 0.0  ;;  %v90_v38 = vstv %s263_s7  ;;  %v98_v42 = vstv %s267_s8 }
  0x20   :  { %v52_v39 = vadd.f32 %v51_v32, %v41_v31  ;;  %v81_v40 = vmax.f32 %v80_v33, 0.0  ;;  %v91_v41 = vadd.f32 %v90_v38, %v88_v34  ;;  %v94_v44 = vstv %s273_s9 }
  0x21   :  { %v73_v43 = vmul.f32 %v72_v29, %v70_v36  ;;  %v99_v45 = vmul.f32 %v98_v42, %v241_v0  ;;  %v101_v46 = vstv %s275_s10  ;;  %v109_v50 = vstv %s279_s11 }
  0x22   :  { %v63_v47 = vadd.f32 %v62_v35, %v52_v39  ;;  %v84_v48 = vmul.f32 %v83_v37, %v81_v40  ;;  %v92_v49 = vmax.f32 %v91_v41, 0.0  ;;  %v105_v52 = vstv %s284_s12 }
  0x23   :  { %v102_v51 = vadd.f32 %v101_v46, %v99_v45  ;;  %v110_v53 = vmul.f32 %v109_v50, %v241_v0  ;;  %v112_v54 = vstv %s286_s13  ;;  %v120_v57 = vstv %s290_s14 }
  0x24   :  { %v74_v55 = vadd.f32 %v73_v43, %v63_v47  ;;  %v95_v56 = vmul.f32 %v94_v44, %v92_v49  ;;  %v123_v58 = vstv %s292_s15  ;;  %v121_v61 = vmul.f32 %v120_v57, %v241_v0 }
  0x25   :  { %v103_v59 = vmax.f32 %v102_v51, 0.0  ;;  %v113_v60 = vadd.f32 %v112_v54, %v110_v53  ;;  %v116_v1 = vstv %s296_s16  ;;  %v131_v2 = vstv %s299_s17 }
  0x26   :  { %v85_v63 = vadd.f32 %v84_v48, %v74_v55  ;;  %v134_v3 = vstv %s301_s18  ;;  %v124_v7 = vadd.f32 %v123_v58, %v121_v61  ;;  %v132_v8 = vmul.f32 %v131_v2, %v241_v0 }
  0x27   :  { %v106_v4 = vmul.f32 %v105_v52, %v103_v59  ;;  %v114_v5 = vmax.f32 %v113_v60, 0.0  ;;  %v127_v10 = vstv %s306_s19  ;;  %v146_v11 = vand.u32 127, %v143_v6 }
  0x28   :  { %v96_v9 = vadd.f32 %v95_v56, %v85_v63  ;;  %v125_v13 = vmax.f32 %v124_v7, 0.0  ;;  %v135_v14 = vadd.f32 %v134_v3, %v132_v8  ;;  %v147_v15 = vmul.u32 128, %v144_v62 }
  0x29   :  { %v117_v12 = vmul.f32 %v116_v1, %v114_v5  ;;  %v138_v17 = vstv %s312_s20  ;;  %v152_v0 = vstv %s334_s0 }
  0x2a   :  { %v107_v16 = vadd.f32 %v106_v4, %v96_v9  ;;  %v128_v18 = vmul.f32 %v127_v10, %v125_v13  ;;  %v136_v19 = vmax.f32 %v135_v14, 0.0  ;;  %v150_v22 = vadd.s32 %v147_v15, %v146_v11 }
  0x2c   :  { %v118_v20 = vadd.f32 %v117_v12, %v107_v16  ;;  %v139_v21 = vmul.f32 %v138_v17, %v136_v19  ;;  %vm153_vm0 = vcmp.lt.s32.totalorder %v150_v22, %v152_v0 }
  0x2e   :  { %v129_v23 = vadd.f32 %v128_v18, %v118_v20 }
  0x30   :  { %v140_v24 = vadd.f32 %v139_v21, %v129_v23 }
  0x32   :  { %v141_v25 = vmax.f32 %v140_v24, 0.0 }
  0x34   :  { %v154_v6 = vsel %vm153_vm0, %v141_v25, 0.0 }
  0x35   :  { %155 = vst [vmem:[%s337_s3] sm:$0x1] %v154_v6 }
  0x36   :  { %160 = vsyncpa [#allocation4], 1 }

</bundles_post_ra>
